<compile_context>
chip_gen: v7x
topology: tpu7x:2x2x1
jax: 0.10.0
libtpu: 0.0.40
codegen_flags: <defaults>
</compile_context>

<pallas_src>
import math
import jax
import jax.numpy as jnp
from jax.experimental import pallas as pl
from jax.experimental.pallas import tpu as pltpu


def _support_kernel(x_ref, w_ref, o_ref):
    # support row-tile = x_tile @ W_padded   (computed once per row tile)
    o_ref[...] = jnp.dot(
        x_ref[...], w_ref[...], preferred_element_type=jnp.float32
    ).astype(o_ref.dtype)


def _aggregate_kernel(adj_ref, s_ref, b_ref, o_ref, acc_ref):
    # out row-tile = sum_k adj(i,k) @ support(k) + bias
    k = pl.program_id(1)

    @pl.when(k == 0)
    def _():
        acc_ref[...] = jnp.zeros_like(acc_ref)

    acc_ref[...] += jnp.dot(
        adj_ref[...], s_ref[...], preferred_element_type=jnp.float32
    )

    @pl.when(k == pl.num_programs(1) - 1)
    def _():
        o_ref[...] = (acc_ref[...] + b_ref[...]).astype(o_ref.dtype)


def gnn4node_forward(x, adj, w1, b1, *, tm=128, tk=128,
                     matmul_dtype=jnp.float32, vmem_limit_bytes=None):
    N, F = x.shape
    H = w1.shape[1]
    assert adj.shape == (N, N)

    tm = min(tm, N)
    tk = min(tk, N)
    assert N % tm == 0 and N % tk == 0

    # Pad hidden dim to a lane-dense multiple of 128 (unmasked stores, dense
    # MXU result columns); zero columns contribute nothing and are sliced off.
    Hp = pl.cdiv(H, 128) * 128
    w1p = jnp.zeros((F, Hp), jnp.float32).at[:, :H].set(w1.astype(jnp.float32))
    b1p = jnp.zeros((1, Hp), jnp.float32).at[:, :H].set(
        b1.reshape(1, H).astype(jnp.float32))

    # Optionally store adj / support as bf16 in HBM (halves DMA bytes, doubles
    # MXU throughput); accumulation stays f32.
    adj_c = adj.astype(matmul_dtype)

    # --- kernel 1: support = x @ W1  (computed once) -------------------------
    support = pl.pallas_call(
        _support_kernel,
        out_shape=jax.ShapeDtypeStruct((N, Hp), matmul_dtype),
        grid_spec=pltpu.PrefetchScalarGridSpec(
            num_scalar_prefetch=0,
            grid=(N // tm,),
            in_specs=[
                pl.BlockSpec((tm, F), lambda i: (i, 0)),   # x row tile
                pl.BlockSpec((F, Hp), lambda i: (0, 0)),   # full (padded) W1
            ],
            out_specs=pl.BlockSpec((tm, Hp), lambda i: (i, 0)),
        ),
        compiler_params=pltpu.CompilerParams(
            dimension_semantics=("parallel",),
            vmem_limit_bytes=vmem_limit_bytes,
        ),
    )(x.astype(jnp.float32), w1p)

    # --- kernel 2: out = adj @ support + b1  (row-tiled, K-tiled contraction) -
    out_p = pl.pallas_call(
        _aggregate_kernel,
        out_shape=jax.ShapeDtypeStruct((N, Hp), jnp.float32),
        grid_spec=pltpu.PrefetchScalarGridSpec(
            num_scalar_prefetch=0,
            grid=(N // tm, N // tk),
            in_specs=[
                pl.BlockSpec((tm, tk), lambda i, k: (i, k)),   # adj tile
                pl.BlockSpec((tk, Hp), lambda i, k: (k, 0)),   # support k-slab
                pl.BlockSpec((1, Hp), lambda i, k: (0, 0)),    # bias
            ],
            out_specs=pl.BlockSpec((tm, Hp), lambda i, k: (i, 0)),
            scratch_shapes=[pltpu.VMEM((tm, Hp), jnp.float32)],
        ),
        compiler_params=pltpu.CompilerParams(
            dimension_semantics=("parallel", "arbitrary"),
            vmem_limit_bytes=vmem_limit_bytes,
        ),
    )(adj_c, support, b1p)

    return out_p[:, :H]


def reference_forward(x, adj, w1, b1):
    support = x @ w1
    return adj @ support + b1[None, :]


if __name__ == "__main__":
    # Small, module-consistent shapes: N nodes, nfeat features, nhid hidden.
    # N=256 so that tm=128 gives grid=(2,...) (both v7x TensorCores busy).
    N, nfeat, nhid = 256, 32, 32
    key = jax.random.PRNGKey(0)
    kx, ka, kw, kb = jax.random.split(key, 4)

    x = jax.random.normal(kx, (N, nfeat), dtype=jnp.float32)
    # dense "adjacency" (torch.spmm on a dense tensor == dense matmul),
    # row-normalized as is typical for GCN-style aggregation.
    adj = (jax.random.uniform(ka, (N, N)) < 0.1).astype(jnp.float32)
    adj = adj / jnp.maximum(adj.sum(axis=1, keepdims=True), 1.0)

    # GraphNeuralNode(nfeat, nhid) init: uniform(-stdv, stdv), stdv=1/sqrt(nhid)
    stdv = 1.0 / math.sqrt(nhid)
    w1 = jax.random.uniform(kw, (nfeat, nhid), minval=-stdv, maxval=stdv,
                            dtype=jnp.float32)
    b1 = jax.random.uniform(kb, (nhid,), minval=-stdv, maxval=stdv,
                            dtype=jnp.float32)

    ref = reference_forward(x, adj, w1, b1)

    # f32 path (exact check)
    out_f32 = jax.block_until_ready(
        gnn4node_forward(x, adj, w1, b1, tm=128, tk=128,
                         matmul_dtype=jnp.float32))
    assert out_f32.shape == (N, nhid)
    assert jnp.allclose(out_f32, ref, atol=1e-4, rtol=1e-4)

    # bf16-matmul path (halved adj HBM traffic, f32 accumulation)
    out_bf16 = jax.block_until_ready(
        gnn4node_forward(x, adj, w1, b1, tm=128, tk=128,
                         matmul_dtype=jnp.bfloat16))
    assert out_bf16.shape == (N, nhid)
    assert jnp.allclose(out_bf16, ref, atol=2e-2, rtol=2e-2)

    print("KERNEL_OK")
</pallas_src>

<mosaic_0001>
module attributes {stable_mosaic.version = 11 : i64} {
  func.func @_support_kernel(%arg0: i32, %arg1: memref<128x32xf32, #tpu.memory_space<vmem>>, %arg2: memref<32x128xf32, #tpu.memory_space<vmem>>, %arg3: memref<128x128xf32, #tpu.memory_space<vmem>>) attributes {dimension_semantics = [#tpu.dimension_semantics<parallel>], iteration_bounds = array<i64: 2>, scalar_prefetch = 0 : i64, scratch_operands = 0 : i64, tpu.core_type = #tpu.core_type<tc>, window_params = [{transform_indices = @transform_0, window_bounds = array<i64: 128, 32>}, {pipeline_mode = #tpu.pipeline_mode<synchronous>, transform_indices = @transform_1, window_bounds = array<i64: 32, 128>}, {transform_indices = @transform_2, window_bounds = array<i64: 128, 128>}]} {
    %c0 = arith.constant 0 : index
    %c0_0 = arith.constant 0 : index
    %0 = vector.load %arg1[%c0, %c0_0] : memref<128x32xf32, #tpu.memory_space<vmem>>, vector<128x32xf32>
    %c0_1 = arith.constant 0 : index
    %c0_2 = arith.constant 0 : index
    %1 = vector.load %arg2[%c0_1, %c0_2] : memref<32x128xf32, #tpu.memory_space<vmem>>, vector<32x128xf32>
    %cst = arith.constant dense<0.000000e+00> : vector<128x128xf32>
    %2 = tpu.matmul %0, %1, %cst {dimension_numbers = #tpu.dot_dimension_numbers<[1], [0], [0], [1], [0, 0, 1, 1], [], []>} : vector<128x32xf32>, vector<32x128xf32>, vector<128x128xf32> -> vector<128x128xf32>
    %c0_3 = arith.constant 0 : index
    %c0_4 = arith.constant 0 : index
    %3 = vector.load %arg3[%c0_3, %c0_4] : memref<128x128xf32, #tpu.memory_space<vmem>>, vector<128x128xf32>
    tpu.vector_store %arg3[%c0_3, %c0_4], %2 {strides = array<i32>} : memref<128x128xf32, #tpu.memory_space<vmem>>, vector<128x128xf32>,
    return
  }
  func.func @transform_0(%arg0: i32) -> (i32, i32) {
    %c0_i32 = arith.constant 0 : i32
    %c0_i32_0 = arith.constant 0 : i32
    return %arg0, %c0_i32 : i32, i32
  }
  func.func @transform_1(%arg0: i32) -> (i32, i32) {
    %c0_i32 = arith.constant 0 : i32
    %c0_i32_0 = arith.constant 0 : i32
    %c0_i32_1 = arith.constant 0 : i32
    return %c0_i32, %c0_i32_0 : i32, i32
  }
  func.func @transform_2(%arg0: i32) -> (i32, i32) {
    %c0_i32 = arith.constant 0 : i32
    %c0_i32_0 = arith.constant 0 : i32
    return %arg0, %c0_i32 : i32, i32
  }
}

</mosaic_0001>

<bundles_post_ra>
// kernel: tpu_custom_call.1
= control target key start
LH: loop header
LB: loop body
LE: loop exit
PB: predicated region body
PF: predicated region fallthrough
CT: control target
= control target key end

     0   :  { %7 = vsyncpa [#allocation3], 0  ;;  %s838_s0 = inlined_call_operand.vmem [shape: f32[256,32], index: 0, kind: input, shape index: {}]   ;;  %s839_s1 = inlined_call_operand.vmem [shape: f32[32,128], index: 1, kind: input, shape index: {}]   ;;  %s840_s2 = inlined_call_operand.hbm [shape: f32[256,128], index: 2, kind: output, shape index: {}]  }
   0x1   :  { %9 = vsyncpa [#allocation3 + $0x1], 0  ;;  %s667_s9 = smov 0   ;;  %s669_s10 = smov 0  }
   0x2   :  { %s671_s11 = smov 0   ;;  %s673_s12 = smov 0  }
   0x3 LB: > { %s688_s13 = sadd.s32 4294967295, %s647_s12   ;;  %s451_s14 = sadd.s32 4294967294, %s647_s12   ;;  %s647_s12 = sphi %s673_s12, %s846_s12   ;;  %s643_s11 = sphi %s671_s11, %s845_s11   ;;  %s639_s10 = sphi %s669_s10, %s844_s10   ;;  %s635_s9 = sphi %s667_s9, %s843_s9  }
   0x4   : > { %s692_s15 = sadd.s32 1, %s647_s12   ;;  %s69_s16 = sadd.s32 1, %s643_s11 }
   0x5   : > { %s66_s17 = ssub.s32 %s647_s12, %s692_s15  ;;  %p79_p0 = scmp.ne.s32.totalorder %s643_s11, %s639_s10 }
   0x6   : > { %p67_p1 = scmp.eq.s32.totalorder %s66_s17, 0  ;;  %p80_p2 = scmp.eq.s32.totalorder %s688_s13, 1 }
   0x7   : > { %p85_p3 = scmp.ne.s32.totalorder %s639_s10, %s635_s9  ;;  %p86_p4 = scmp.eq.s32.totalorder %s451_s14, 1 }
   0x8   : > { %s703_s18 = scalar_select %p67_p1, %s643_s11, %s69_s16  }
   0x9   : > { %p705_p5 = por %p80_p2, %p79_p0  ;;  %p709_p6 = por %p86_p4, %p85_p3 }
   0xa   : > { %p454_p7 = scmp.ge.s32.totalorder %s647_s12, 1  ;;  %p116_p8 = scmp.lt.s32.totalorder %s647_s12, 3 }
   0xc   : > { %p117_p9 = pnand %p454_p7, %p116_p8 }
   0xd   : > { %v161_v0 = vld [vmem:[%s839_s1] sm:$0xff] (!%p117_p9)  ;;  %v162_v1 = vld [vmem:[%s839_s1 + $0x8] sm:$0xff] (!%p117_p9)  ;;  %v163_v2 = vld [vmem:[%s839_s1 + $0x10] sm:$0xff] (!%p117_p9)  ;;  %s456_s27 = sshll.u32 (!%p117_p9), %s688_s13, 4  ;;  %vm165_vm0 = vcmask (!%p117_p9), 261120   ;;  %s135_s6 = sand.u32 (!%p117_p9), 1, %s639_s10  }
   0xe   : > { %120 = sbr.rel (%p117_p9) target bundleno = 267 (0x10b), region = 28  ;;  %v532_v3 = vpack.c.bf16 (!%p117_p9), %v162_v1, %v161_v0  ;;  %v164_v4 = vld [vmem:[%s839_s1 + $0x18] sm:$0xff] (!%p117_p9)  ;;  %p139_p10 = scmp.lt.s32.totalorder (!%p117_p9), %s456_s27, 31 }
   0xf   : > { %v536_v5 = vpack.c.bf16 (!%p117_p9), %v164_v4, %v163_v2  ;;  %s455_s7 = sshll.u32 (!%p117_p9), %s135_s6, 7  ;;  %s479_s14 = sshll.u32 (!%p117_p9), %s688_s13, 11 }
  0x10   : > { %533 = vmatprep.subr.bf16.mxu0 (!%p117_p9), %v532_v3  ;;  %540 = vmatprep.subr.bf16.mxu1 (!%p117_p9), %v532_v3  ;;  %s768_s8 = scalar_lea.vmem (!%p117_p9), [#allocation2], %s455_s7  ;;  %s787_s22 = scalar_lea.hbm (!%p117_p9), %s840_s2, %s479_s14 }
  0x11   : > { %535 = vmatpush3.bf16.msra.mxu0 (!%p117_p9), %v532_v3  ;;  %542 = vmatpush3.bf16.msra.mxu1 (!%p117_p9), %v532_v3  ;;  %s389_s16 = sshll.u32 (!%p117_p9), %s768_s8, 4  ;;  %s797_s13 = scalar_lea.sflag (!%p117_p9), [#allocation3], %s135_s6  ;;  %s789_s16 = int_to_ptr.vmem [resolvable:$true] %s389_s16 }
  0x12   : > { %537 = vmatprep.subr.bf16.mxu0 (!%p117_p9), %v536_v5  ;;  %541 = vmatprep.subr.bf16.mxu1 (!%p117_p9), %v536_v5  ;;  %s585_s23 = scalar_lea.vmem (!%p117_p9), %s789_s16, 2048  ;;  %s649_s24 = smov (!%p117_p9), [#allocation2]  }
  0x13   : > { %p586_p11 = scmp.ne.s32.totalorder (!%p117_p9), %s789_s16, %s585_s23  ;;  %s589_s25 = sshll.u32 (!%p117_p9), %s649_s24, 4  ;;  %s590_s25 = int_to_ptr.vmem [resolvable:$false] %s589_s25 }
  0x14   : > { %s591_s26 = scalar_lea.vmem (!%p117_p9), %s590_s25, 4096  ;;  %p592_p0 = scmp.lt.s32.totalorder (!%p117_p9), %s789_s16, %s590_s25 }
  0x15   : > { %s848_s27 = smov (!%p139_p10, %s456_s27), 31  ;;  %539 = vmatpush3.bf16.msra.mxu0 %v536_v5  ;;  %543 = vmatpush3.bf16.msra.mxu1 %v536_v5  ;;  %p587_p12 = pnand %p586_p11, %p705_p5 }
  0x16   : > { %s457_s30 = sshll.u32 %s848_s27, 3  ;;  %p593_p1 = scmp.lt.s32.totalorder %s591_s26, %s585_s23 }
  0x17   : > { %s731_s5 = scalar_lea.vmem %s838_s0, %s457_s30  ;;  %p588_p13 = pneg %p587_p12 }
  0x18   : > { %v145_v6 = vld [vmem:[%s731_s5] sm:$0xff]  ;;  %v146_v8 = vld [vmem:[%s731_s5 + $0x8] sm:$0xff]  ;;  %v147_v10 = vld [vmem:[%s731_s5 + $0x10] sm:$0xff]  ;;  %p594_p2 = por %p593_p1, %p592_p0 }
  0x19   : > { %v153_v7 = vld [vmem:[%s731_s5 + $0x40] sm:$0xff]  ;;  %v154_v9 = vld [vmem:[%s731_s5 + $0x48] sm:$0xff]  ;;  %508 = vmatprep.mubr.msk.f32.mxu0 %vm165_vm0, %v145_v6  ;;  %v155_v11 = vld [vmem:[%s731_s5 + $0x50] sm:$0xff] }
  0x1a   : > { %520 = vmatprep.mubr.msk.f32.mxu1 %vm165_vm0, %v153_v7  ;;  %509 = vmatmul.mubr.msk.f32.vlgmr.msra.gmra.mrb[0].mxu0 %vm165_vm0, %v146_v8  ;;  %v148_v12 = vld [vmem:[%s731_s5 + $0x18] sm:$0xff]  ;;  %v149_v14 = vld [vmem:[%s731_s5 + $0x20] sm:$0xff]  ;;  %v150_v16 = vld [vmem:[%s731_s5 + $0x28] sm:$0xff]  ;;  %p595_p3 = pnand %p594_p2, %p588_p13 }
  0x1b   : > { %521 = vmatmul.mubr.msk.f32.vlgmr.msra.gmra.mrb[0].mxu1 %vm165_vm0, %v154_v9  ;;  %511 = vmatprep.mubr.msk.f32.mxu0 %vm165_vm0, %v147_v10  ;;  %v156_v13 = vld [vmem:[%s731_s5 + $0x58] sm:$0xff]  ;;  %v157_v15 = vld [vmem:[%s731_s5 + $0x60] sm:$0xff]  ;;  %v158_v17 = vld [vmem:[%s731_s5 + $0x68] sm:$0xff] }
  0x1c   : > { %523 = vmatprep.mubr.msk.f32.mxu1 %vm165_vm0, %v155_v11  ;;  %v151_v18 = vld [vmem:[%s731_s5 + $0x30] sm:$0xff]  ;;  %v152_v20 = vld [vmem:[%s731_s5 + $0x38] sm:$0xff] }
  0x1d   : > { %v159_v19 = vld [vmem:[%s731_s5 + $0x70] sm:$0xff]  ;;  %v160_v21 = vld [vmem:[%s731_s5 + $0x78] sm:$0xff] }
  0x1e   : > { %512 = vmatmul.mubr.msk.f32.gmra.mrb[2].mxu0 %vm165_vm0, %v148_v12 }
  0x1f   : > { %524 = vmatmul.mubr.msk.f32.gmra.mrb[2].mxu1 %vm165_vm0, %v156_v13  ;;  %514 = vmatprep.mubr.msk.f32.mxu0 %vm165_vm0, %v149_v14 }
  0x20   : > { %526 = vmatprep.mubr.msk.f32.mxu1 %vm165_vm0, %v157_v15 }
  0x22   : > { %515 = vmatmul.mubr.msk.f32.gmra.mrb[4].mxu0 %vm165_vm0, %v150_v16 }
  0x23   : > { %527 = vmatmul.mubr.msk.f32.gmra.mrb[4].mxu1 %vm165_vm0, %v158_v17  ;;  %517 = vmatprep.mubr.msk.f32.mxu0 %vm165_vm0, %v151_v18 }
  0x24   : > { %529 = vmatprep.mubr.msk.f32.mxu1 %vm165_vm0, %v159_v19 }
  0x26   : > { %518 = vmatmul.mubr.msk.f32.gmra.mrb[6].mxu0 %vm165_vm0, %v152_v20 }
  0x27   : > { %530 = vmatmul.mubr.msk.f32.gmra.mrb[6].mxu1 %vm165_vm0, %v160_v21 }
  0xed   : > { %v510_v22 = vpop.f32.mrb[0].mxu0 }
  0xee   : > { %v522_v23 = vpop.f32.mrb[0].mxu1  ;;  %360 = vst [vmem:[%s768_s8 + $0x8] sm:$0xff] %v510_v22  ;;  %v280_v24 = vpop.f32.mrb[1].mxu0 }
  0xef   : > { %368 = vst [vmem:[%s768_s8 + $0x48] sm:$0xff] %v522_v23  ;;  %v320_v25 = vpop.f32.mrb[1].mxu1  ;;  %359 = vst [vmem:[%s768_s8] sm:$0xff] %v280_v24 }
  0xf0   : > { %367 = vst [vmem:[%s768_s8 + $0x40] sm:$0xff] %v320_v25 }
  0xf1   : > { %v513_v26 = vpop.f32.mrb[2].mxu0 }
  0xf2   : > { %v525_v27 = vpop.f32.mrb[2].mxu1  ;;  %362 = vst [vmem:[%s768_s8 + $0x18] sm:$0xff] %v513_v26  ;;  %v290_v28 = vpop.f32.mrb[3].mxu0 }
  0xf3   : > { %370 = vst [vmem:[%s768_s8 + $0x58] sm:$0xff] %v525_v27  ;;  %v330_v29 = vpop.f32.mrb[3].mxu1  ;;  %361 = vst [vmem:[%s768_s8 + $0x10] sm:$0xff] %v290_v28 }
  0xf4   : > { %369 = vst [vmem:[%s768_s8 + $0x50] sm:$0xff] %v330_v29 }
  0xf5   : > { %v516_v30 = vpop.f32.mrb[4].mxu0 }
  0xf6   : > { %v528_v31 = vpop.f32.mrb[4].mxu1  ;;  %364 = vst [vmem:[%s768_s8 + $0x28] sm:$0xff] %v516_v30  ;;  %v300_v32 = vpop.f32.mrb[5].mxu0 }
  0xf7   : > { %372 = vst [vmem:[%s768_s8 + $0x68] sm:$0xff] %v528_v31  ;;  %v340_v33 = vpop.f32.mrb[5].mxu1  ;;  %363 = vst [vmem:[%s768_s8 + $0x20] sm:$0xff] %v300_v32 }
  0xf8   : > { %371 = vst [vmem:[%s768_s8 + $0x60] sm:$0xff] %v340_v33 }
  0xf9   : > { %v519_v34 = vpop.f32.mrb[6].mxu0 }
  0xfa   : > { %v531_v35 = vpop.f32.mrb[6].mxu1  ;;  %366 = vst [vmem:[%s768_s8 + $0x38] sm:$0xff] %v519_v34  ;;  %v310_v36 = vpop.f32.mrb[7].mxu0 }
  0xfb   : > { %374 = vst [vmem:[%s768_s8 + $0x78] sm:$0xff] %v531_v35  ;;  %v350_v37 = vpop.f32.mrb[7].mxu1  ;;  %365 = vst [vmem:[%s768_s8 + $0x30] sm:$0xff] %v310_v36 }
  0xfc   : > { %373 = vst [vmem:[%s768_s8 + $0x70] sm:$0xff] %v350_v37 }
  0xfd   : > { %598 = shalt.err (!%p595_p3)
}
  0xfe   : > { %s599_s27 = scalar_lea.hbm %s787_s22, 2048  ;;  %s603_s30 = scalar_lea.hbm %s840_s2, 4096 }
  0xff   : > { %p600_p4 = scmp.ne.s32.totalorder %s787_s22, %s599_s27  ;;  %p604_p9 = scmp.lt.u32.totalorder %s787_s22, %s840_s2 }
 0x100   : > { %p605_p10 = scmp.lt.u32.totalorder %s603_s30, %s599_s27  ;;  %p607_p12 = scmp.lt.u32.totalorder %s599_s27, %s787_s22 }
 0x101   : > { %p601_p7 = pnand %p600_p4, %p705_p5 }
 0x102   : > { %p606_p11 = por %p605_p10, %p604_p9 }
 0x103   : > { %p602_p8 = pneg %p601_p7 }
 0x104   : > { %p608_p13 = por %p607_p12, %p606_p11 }
 0x106   : > { %p609_p0 = pnand %p608_p13, %p602_p8 }
 0x108   : > { %612 = shalt.err (!%p609_p0)
}
 0x109   : > { %s650_s5 = smov 128   ;;  %s651_s6 = smov 8  }
 0x10a   : > { %544 = dma.vmem_to_hbm [thread:$0]  (%p705_p5), %s789_s16, 2048, %s787_s22, %s797_s13, %s650_s5, %s650_s5, %s651_s6  }
 0x10b PF: > { %p550_p1 = scmp.ge.s32.totalorder %s647_s12, 2  ;;  %s404_s7 = sand.u32 1, %s635_s9  }
 0x10c   : > { %s405_s8 = scalar_lea.sflag [#allocation3], %s404_s7 }
 0x10d   : > { %p547_p2 = pnand %p550_p1, %p709_p6 }
 0x10f   : > { %630 = dma.done.wait (!%p547_p2), %s405_s8, 2048  }
 0x110   : > { %632 = vsyncadd (!%p547_p2), %s405_s8, 4294965248  ;;  %p12_p3 = scmp.ge.s32.totalorder %s692_s15, 4   ;;  %s843_s9 = smov %s639_s10 }
 0x111   : > { %s844_s10 = smov %s643_s11  ;;  %s845_s11 = smov %s703_s18 }
 0x112   : > { %s846_s12 = smov %s692_s15  ;;  %14 = sbr.rel (!%p12_p3) target bundleno = 3 (0x3), region = 63 }
 0x119   :  { %410 = vsyncpa [#allocation3], 1 }
 0x11a   :  { %412 = vsyncpa [#allocation3 + $0x1], 1 }

</bundles_post_ra>
